<compile_context>
chip_gen: v7x
topology: tpu7x:2x2x1
jax: 0.10.0
libtpu: 0.0.40
codegen_flags: <defaults>
</compile_context>

<pallas_src>
import jax
import jax.numpy as jnp
from jax.experimental import pallas as pl
from jax.experimental.pallas import tpu as pltpu


def _round_up(x, m):
    return (x + m - 1) // m * m


def mlp_kernel(e_ref, w1_ref, b1_ref, w2_ref, b2_ref, w3_ref, b3_ref, o_ref):
    # e_ref : (1, TB)     f32   lane-dense batch slice of E
    # w1_ref: (64, 1)     f32   fc_E1.weight  (out, in=1)
    # b1_ref: (64, 1)     f32
    # w2_ref: (64, 64)    bf16  fc1.weight    (out, in)
    # b2_ref: (64, 1)     f32
    # w3_ref: (Dout, 64)  bf16  fc2.weight    (out, in)
    # b3_ref: (Dout, 1)   f32
    # o_ref : (Dout, TB)  f32   lane-dense output slice
    e = e_ref[...]                                            # (1, TB)

    # fc_E1: Linear(1, 64). K=1 -> broadcasted outer product on the VPU
    # (an MXU pass here would waste 255/256 of the array).
    h1 = jnp.maximum(w1_ref[...] * e + b1_ref[...], 0.0)      # (64, TB) f32

    # fc1: Linear(64, 64) on the MXU, bf16 operands / f32 accumulation.
    h2 = jnp.dot(w2_ref[...], h1.astype(jnp.bfloat16),
                 preferred_element_type=jnp.float32)          # (64, TB) f32
    h2 = jnp.maximum(h2 + b2_ref[...], 0.0)

    # fc2: Linear(64, Dout) on the MXU; result is lane-dense (Dout, TB).
    out = jnp.dot(w3_ref[...], h2.astype(jnp.bfloat16),
                  preferred_element_type=jnp.float32)         # (Dout, TB) f32
    o_ref[...] = (out + b3_ref[...]).astype(o_ref.dtype)


def mlp_model1_forward(A, B, C, D, E, F, G, H, I, params, *, max_batch_tile=4096):
    """Matches MLPModel1.forward(A,...,I): only E is used."""
    del A, B, C, D, F, G, H, I  # unused, exactly as in the PyTorch module
    w1, b1, w2, b2, w3, b3 = params  # PyTorch layout: w (out, in), b (out,)
    batch = E.shape[0]
    dout = w3.shape[0]

    # Batch tile: lane-dense (multiple of 128), capped so the double-buffered
    # VMEM working set stays a few MiB (safe on v5e's 16 MiB scoped default
    # and v7x's 64 MiB physical VMEM).
    tb = min(max_batch_tile, _round_up(max(batch, 1), 128))
    b_pad = _round_up(batch, tb)

    # (B, 1) -> (1, B): row-major contiguous, free metadata reshape; the batch
    # becomes the lane dimension (no 128x lane-padding waste for E in VMEM).
    e_t = E.astype(jnp.float32).reshape(1, batch)
    if b_pad != batch:
        e_t = jnp.pad(e_t, ((0, 0), (0, b_pad - batch)))

    # Weights/biases in feature-major column form. Matmul weights as bf16
    # (MXU-native on v6e/v7x, fine on v5e); biases & elementwise stay f32.
    w1c = w1.reshape(64, 1).astype(jnp.float32)
    b1c = b1.reshape(64, 1).astype(jnp.float32)
    w2c = w2.astype(jnp.bfloat16)                  # (64, 64)
    b2c = b2.reshape(64, 1).astype(jnp.float32)
    w3c = w3.astype(jnp.bfloat16)                  # (Dout, 64)
    b3c = b3.reshape(dout, 1).astype(jnp.float32)

    # Constant index_map -> weights stay resident in VMEM across grid steps.
    const = lambda shape: pl.BlockSpec(shape, lambda i: (0, 0))

    out_t = pl.pallas_call(
        mlp_kernel,
        out_shape=jax.ShapeDtypeStruct((dout, b_pad), jnp.float32),
        grid_spec=pltpu.PrefetchScalarGridSpec(
            num_scalar_prefetch=0,
            grid=(b_pad // tb,),
            in_specs=[
                pl.BlockSpec((1, tb), lambda i: (0, i)),   # E, lane-dense batch
                const((64, 1)),                            # fc_E1.weight
                const((64, 1)),                            # fc_E1.bias
                const((64, 64)),                           # fc1.weight (bf16)
                const((64, 1)),                            # fc1.bias
                const((dout, 64)),                         # fc2.weight (bf16)
                const((dout, 1)),                          # fc2.bias
            ],
            out_specs=pl.BlockSpec((dout, tb), lambda i: (0, i)),
        ),
        compiler_params=pltpu.CompilerParams(
            dimension_semantics=("parallel",),   # megacore sharding on v7x
            vmem_limit_bytes=32 * 1024 * 1024,
        ),
    )(e_t, w1c, b1c, w2c, b2c, w3c, b3c)

    # (Dout, B_pad) -> (B, Dout): tiny wrapper-side transpose + unpad.
    return out_t.T[:batch]


def init_params(key, output_dim):
    """Deterministic synthetic parameters in PyTorch Linear layout (out, in)."""
    k1, k2, k3, k4, k5, k6 = jax.random.split(key, 6)
    w1 = jax.random.normal(k1, (64, 1), jnp.float32) * 0.5          # fc_E1.weight
    b1 = jax.random.normal(k2, (64,), jnp.float32) * 0.1            # fc_E1.bias
    w2 = jax.random.normal(k3, (64, 64), jnp.float32) * 0.125       # fc1.weight
    b2 = jax.random.normal(k4, (64,), jnp.float32) * 0.1            # fc1.bias
    w3 = jax.random.normal(k5, (output_dim, 64), jnp.float32) * 0.125  # fc2.weight
    b3 = jax.random.normal(k6, (output_dim,), jnp.float32) * 0.1       # fc2.bias
    return (w1, b1, w2, b2, w3, b3)


def reference_forward(E, params):
    """Pure-f32 JAX reference matching the PyTorch module."""
    w1, b1, w2, b2, w3, b3 = params
    h1 = jax.nn.relu(E @ w1.T + b1)
    h2 = jax.nn.relu(h1 @ w2.T + b2)
    return h2 @ w3.T + b3


if __name__ == "__main__":
    key = jax.random.PRNGKey(0)
    k_params, k_in = jax.random.split(key)

    batch = 8
    output_dim = 4
    params = init_params(k_params, output_dim)

    # Nine inputs, mirroring forward(A, B, C, D, E, F, G, H, I).
    keys = jax.random.split(k_in, 9)
    feat_dims = [3, 3, 3, 3, 1, 3, 3, 3, 3]  # E has feature dim 1 (fc_E1: Linear(1, 64))
    inputs = [jax.random.normal(k, (batch, d), jnp.float32)
              for k, d in zip(keys, feat_dims)]
    A, B, C, D, E, F, G, H, I = inputs

    out = mlp_model1_forward(A, B, C, D, E, F, G, H, I, params)
    out = jax.block_until_ready(out)

    ref = reference_forward(E, params)
    assert out.shape == (batch, output_dim)
    # bf16 MXU operands with f32 accumulation -> relaxed tolerance vs f32 ref.
    assert jnp.allclose(out, ref, atol=5e-2, rtol=5e-2), (
        f"max abs err {jnp.max(jnp.abs(out - ref))}")

    print("KERNEL_OK")
</pallas_src>

<mosaic_0001>
module attributes {stable_mosaic.version = 11 : i64} {
  func.func @mlp_kernel(%arg0: i32, %arg1: memref<1x128xf32, #tpu.memory_space<vmem>>, %arg2: memref<64x1xf32, #tpu.memory_space<vmem>>, %arg3: memref<64x1xf32, #tpu.memory_space<vmem>>, %arg4: memref<64x64xbf16, #tpu.memory_space<vmem>>, %arg5: memref<64x1xf32, #tpu.memory_space<vmem>>, %arg6: memref<4x64xbf16, #tpu.memory_space<vmem>>, %arg7: memref<4x1xf32, #tpu.memory_space<vmem>>, %arg8: memref<4x128xf32, #tpu.memory_space<vmem>>) attributes {dimension_semantics = [#tpu.dimension_semantics<parallel>], iteration_bounds = array<i64: 1>, scalar_prefetch = 0 : i64, scratch_operands = 0 : i64, tpu.core_type = #tpu.core_type<tc>, window_params = [{transform_indices = @transform_0, window_bounds = array<i64: 1, 128>}, {pipeline_mode = #tpu.pipeline_mode<synchronous>, transform_indices = @transform_1, window_bounds = array<i64: 64, 1>}, {pipeline_mode = #tpu.pipeline_mode<synchronous>, transform_indices = @transform_2, window_bounds = array<i64: 64, 1>}, {pipeline_mode = #tpu.pipeline_mode<synchronous>, transform_indices = @transform_3, window_bounds = array<i64: 64, 64>}, {pipeline_mode = #tpu.pipeline_mode<synchronous>, transform_indices = @transform_4, window_bounds = array<i64: 64, 1>}, {pipeline_mode = #tpu.pipeline_mode<synchronous>, transform_indices = @transform_5, window_bounds = array<i64: 4, 64>}, {pipeline_mode = #tpu.pipeline_mode<synchronous>, transform_indices = @transform_6, window_bounds = array<i64: 4, 1>}, {transform_indices = @transform_7, window_bounds = array<i64: 4, 128>}]} {
    %c0 = arith.constant 0 : index
    %c0_0 = arith.constant 0 : index
    %0 = vector.load %arg1[%c0, %c0_0] : memref<1x128xf32, #tpu.memory_space<vmem>>, vector<1x128xf32>
    %c0_1 = arith.constant 0 : index
    %c0_2 = arith.constant 0 : index
    %1 = vector.load %arg2[%c0_1, %c0_2] : memref<64x1xf32, #tpu.memory_space<vmem>>, vector<64x1xf32>
    %2 = vector.broadcast %1 : vector<64x1xf32> to vector<64x128xf32>
    %3 = vector.broadcast %0 : vector<1x128xf32> to vector<64x128xf32>
    %4 = arith.mulf %2, %3 : vector<64x128xf32>
    %c0_3 = arith.constant 0 : index
    %c0_4 = arith.constant 0 : index
    %5 = vector.load %arg3[%c0_3, %c0_4] : memref<64x1xf32, #tpu.memory_space<vmem>>, vector<64x1xf32>
    %6 = vector.broadcast %5 : vector<64x1xf32> to vector<64x128xf32>
    %7 = arith.addf %4, %6 : vector<64x128xf32>
    %cst = arith.constant 0.000000e+00 : f32
    %8 = vector.broadcast %cst : f32 to vector<64x128xf32>
    %9 = arith.maximumf %7, %8 : vector<64x128xf32>
    %c0_5 = arith.constant 0 : index
    %c0_6 = arith.constant 0 : index
    %10 = vector.load %arg4[%c0_5, %c0_6] : memref<64x64xbf16, #tpu.memory_space<vmem>>, vector<64x64xbf16>
    %11 = arith.truncf %9 : vector<64x128xf32> to vector<64x128xbf16>
    %cst_7 = arith.constant dense<0.000000e+00> : vector<64x128xf32>
    %12 = tpu.matmul %10, %11, %cst_7 {dimension_numbers = #tpu.dot_dimension_numbers<[1], [0], [0], [1], [0, 0, 1, 1], [], []>} : vector<64x64xbf16>, vector<64x128xbf16>, vector<64x128xf32> -> vector<64x128xf32>
    %c0_8 = arith.constant 0 : index
    %c0_9 = arith.constant 0 : index
    %13 = vector.load %arg5[%c0_8, %c0_9] : memref<64x1xf32, #tpu.memory_space<vmem>>, vector<64x1xf32>
    %14 = vector.broadcast %13 : vector<64x1xf32> to vector<64x128xf32>
    %15 = arith.addf %12, %14 : vector<64x128xf32>
    %cst_10 = arith.constant 0.000000e+00 : f32
    %16 = vector.broadcast %cst_10 : f32 to vector<64x128xf32>
    %17 = arith.maximumf %15, %16 : vector<64x128xf32>
    %c0_11 = arith.constant 0 : index
    %c0_12 = arith.constant 0 : index
    %18 = vector.load %arg6[%c0_11, %c0_12] : memref<4x64xbf16, #tpu.memory_space<vmem>>, vector<4x64xbf16>
    %19 = arith.truncf %17 : vector<64x128xf32> to vector<64x128xbf16>
    %cst_13 = arith.constant dense<0.000000e+00> : vector<4x128xf32>
    %20 = tpu.matmul %18, %19, %cst_13 {dimension_numbers = #tpu.dot_dimension_numbers<[1], [0], [0], [1], [0, 0, 1, 1], [], []>} : vector<4x64xbf16>, vector<64x128xbf16>, vector<4x128xf32> -> vector<4x128xf32>
    %c0_14 = arith.constant 0 : index
    %c0_15 = arith.constant 0 : index
    %21 = vector.load %arg7[%c0_14, %c0_15] : memref<4x1xf32, #tpu.memory_space<vmem>>, vector<4x1xf32>
    %22 = vector.broadcast %21 : vector<4x1xf32> to vector<4x128xf32>
    %23 = arith.addf %20, %22 : vector<4x128xf32>
    %c0_16 = arith.constant 0 : index
    %c0_17 = arith.constant 0 : index
    %24 = vector.load %arg8[%c0_16, %c0_17] : memref<4x128xf32, #tpu.memory_space<vmem>>, vector<4x128xf32>
    tpu.vector_store %arg8[%c0_16, %c0_17], %23 {strides = array<i32>} : memref<4x128xf32, #tpu.memory_space<vmem>>, vector<4x128xf32>,
    return
  }
  func.func @transform_0(%arg0: i32) -> (i32, i32) {
    %c0_i32 = arith.constant 0 : i32
    %c0_i32_0 = arith.constant 0 : i32
    return %c0_i32, %arg0 : i32, i32
  }
  func.func @transform_1(%arg0: i32) -> (i32, i32) {
    %c0_i32 = arith.constant 0 : i32
    %c0_i32_0 = arith.constant 0 : i32
    %c0_i32_1 = arith.constant 0 : i32
    return %c0_i32, %c0_i32_0 : i32, i32
  }
  func.func @transform_2(%arg0: i32) -> (i32, i32) {
    %c0_i32 = arith.constant 0 : i32
    %c0_i32_0 = arith.constant 0 : i32
    %c0_i32_1 = arith.constant 0 : i32
    return %c0_i32, %c0_i32_0 : i32, i32
  }
  func.func @transform_3(%arg0: i32) -> (i32, i32) {
    %c0_i32 = arith.constant 0 : i32
    %c0_i32_0 = arith.constant 0 : i32
    %c0_i32_1 = arith.constant 0 : i32
    return %c0_i32, %c0_i32_0 : i32, i32
  }
  func.func @transform_4(%arg0: i32) -> (i32, i32) {
    %c0_i32 = arith.constant 0 : i32
    %c0_i32_0 = arith.constant 0 : i32
    %c0_i32_1 = arith.constant 0 : i32
    return %c0_i32, %c0_i32_0 : i32, i32
  }
  func.func @transform_5(%arg0: i32) -> (i32, i32) {
    %c0_i32 = arith.constant 0 : i32
    %c0_i32_0 = arith.constant 0 : i32
    %c0_i32_1 = arith.constant 0 : i32
    return %c0_i32, %c0_i32_0 : i32, i32
  }
  func.func @transform_6(%arg0: i32) -> (i32, i32) {
    %c0_i32 = arith.constant 0 : i32
    %c0_i32_0 = arith.constant 0 : i32
    %c0_i32_1 = arith.constant 0 : i32
    return %c0_i32, %c0_i32_0 : i32, i32
  }
  func.func @transform_7(%arg0: i32) -> (i32, i32) {
    %c0_i32 = arith.constant 0 : i32
    %c0_i32_0 = arith.constant 0 : i32
    return %c0_i32, %arg0 : i32, i32
  }
}

</mosaic_0001>

<bundles_post_ra>
// kernel: tpu_custom_call.1
= control target key start
LH: loop header
LB: loop body
LE: loop exit
PB: predicated region body
PF: predicated region fallthrough
CT: control target
= control target key end

     0   :  { %v475_v2 = vmov 0   ;;  %s629_s0 = inlined_call_operand.vmem [shape: f32[1,128], index: 0, kind: input, shape index: {}]   ;;  %s630_s1 = inlined_call_operand.vmem [shape: f32[64,1], index: 1, kind: input, shape index: {}]   ;;  %s631_s2 = inlined_call_operand.vmem [shape: f32[64,1], index: 2, kind: input, shape index: {}]   ;;  %s632_s3 = inlined_call_operand.vmem [shape: bf16[64,64], index: 3, kind: input, shape index: {}]   ;;  %s633_s4 = inlined_call_operand.vmem [shape: f32[64,1], index: 4, kind: input, shape index: {}]   ;;  %s634_s5 = inlined_call_operand.vmem [shape: bf16[4,64], index: 5, kind: input, shape index: {}]   ;;  %s635_s6 = inlined_call_operand.vmem [shape: f32[4,1], index: 6, kind: input, shape index: {}]   ;;  %s636_s7 = inlined_call_operand.hbm [shape: f32[4,128], index: 7, kind: output, shape index: {}]  }
   0x1   :  { %v91_v0 = vld [vmem:[%s631_s2] sm:$0xff]  ;;  %446 = vset.pattern.permute.xlu1 %v475_v2  ;;  %445 = vset.pattern.permute.xlu0 %v475_v2  ;;  %v92_v3 = vld [vmem:[%s631_s2 + $0x8] sm:$0xff]  ;;  %v32_v5 = vld [vmem:[%s630_s1 + $0x18] sm:$0xff] }
   0x2   :  { %v29_v1 = vld [vmem:[%s630_s1] sm:$0xff]  ;;  %101 = vperm.xlu1 %446, %v91_v0   ;;  %v30_v4 = vld [vmem:[%s630_s1 + $0x8] sm:$0xff]  ;;  %v31_v6 = vld [vmem:[%s630_s1 + $0x10] sm:$0xff] }
   0x3   :  { %39 = vperm.xlu0 %445, %v29_v1   ;;  %v94_v7 = vld [vmem:[%s631_s2 + $0x18] sm:$0xff]  ;;  %v93_v8 = vld [vmem:[%s631_s2 + $0x10] sm:$0xff] }
   0x6   :  { %106 = vperm.xlu1 %446, %v92_v3  }
   0x7   :  { %44 = vperm.xlu0 %445, %v30_v4  }
   0xa   :  { %54 = vperm.xlu1 %446, %v32_v5  }
   0xb   :  { %49 = vperm.xlu0 %445, %v31_v6  }
   0xc   :  { %12 = vsyncpa [#allocation3], 0  ;;  %v34_v9 = vld [vmem:[%s630_s1 + $0x28] sm:$0xff]  ;;  %v33_v10 = vld [vmem:[%s630_s1 + $0x20] sm:$0xff]  ;;  %vm235_vm0 = vcmask 523264   ;;  %vm477_vm1 = vmmov 0  }
   0xd   :  { %v96_v11 = vld [vmem:[%s631_s2 + $0x28] sm:$0xff]  ;;  %v95_v12 = vld [vmem:[%s631_s2 + $0x20] sm:$0xff]  ;;  %v36_v13 = vld [vmem:[%s630_s1 + $0x38] sm:$0xff]  ;;  %s478_s11 = smov [#allocation2]  }
   0xe   :  { %116 = vperm.xlu1 %446, %v94_v7   ;;  %v35_v14 = vld [vmem:[%s630_s1 + $0x30] sm:$0xff]  ;;  %v98_v15 = vld [vmem:[%s631_s2 + $0x38] sm:$0xff]  ;;  %v168_v17 = vld [vmem:[%s633_s4 + $0x8] sm:$0xff]  ;;  %s382_s12 = sshll.u32 %s478_s11, 4  ;;  %s383_s12 = int_to_ptr.vmem [resolvable:$true] %s382_s12 }
   0xf   :  { %111 = vperm.xlu0 %445, %v93_v8   ;;  %v97_v16 = vld [vmem:[%s631_s2 + $0x30] sm:$0xff]  ;;  %v167_v18 = vld [vmem:[%s633_s4] sm:$0xff]  ;;  %v170_v19 = vld [vmem:[%s633_s4 + $0x18] sm:$0xff]  ;;  %s451_s13 = scalar_lea.vmem %s383_s12, 64  ;;  %p456_p1 = scmp.lt.s32.totalorder %s383_s12, %s383_s12 }
  0x10   :  { %v169_v20 = vld [vmem:[%s633_s4 + $0x10] sm:$0xff]  ;;  %v447_v21 = vld [vmem:[%s632_s3] sm:$0xff]   ;;  %v172_v22 = vld [vmem:[%s633_s4 + $0x28] sm:$0xff]  ;;  %p452_p0 = scmp.ne.s32.totalorder %s383_s12, %s451_s13  ;;  %p457_p2 = scmp.lt.s32.totalorder %s451_s13, %s451_s13 }
  0x11   :  { %v171_v23 = vld [vmem:[%s633_s4 + $0x20] sm:$0xff]  ;;  %421 = vmatprep.mubr.msk.bf16.mxu0 %vm235_vm0, %v447_v21  ;;  %v174_v24 = vld [vmem:[%s633_s4 + $0x38] sm:$0xff]  ;;  %v173_v25 = vld [vmem:[%s633_s4 + $0x30] sm:$0xff] }
  0x12   :  { %64 = vperm.xlu1 %446, %v34_v9   ;;  %v326_v26 = vld [vmem:[%s635_s6] sm:$0xf]  ;;  %v448_v8 = vld [vmem:[%s632_s3 + $0x8] sm:$0xff]   ;;  %v449_v9 = vld [vmem:[%s632_s3 + $0x10] sm:$0xff]   ;;  %p458_p3 = por %p457_p2, %p456_p1 }
  0x13   :  { %59 = vperm.xlu0 %445, %v33_v10   ;;  %v390_v27 = vld [vmem:[%s629_s0] ss:$0 sm:$0xff]  ;;  %v450_v10 = vld [vmem:[%s632_s3 + $0x18] sm:$0xff]  }
  0x14   :  { %p459_p4 = pnand %p458_p3, %p452_p0 }
  0x16   :  { %126 = vperm.xlu1 %446, %v96_v11   ;;  %v476_v11 = vmov 0.0  }
  0x17   :  { %121 = vperm.xlu0 %445, %v95_v12   ;;  %429 = vmatprep.subr.bf16.mxu1 %v476_v11 }
  0x18   :  { %437 = vmatprep.mubr.msk.bf16.mxu1 %vm477_vm1, %v476_v11 }
  0x1a   :  { %74 = vperm.xlu1 %446, %v36_v13  }
  0x1b   :  { %69 = vperm.xlu0 %445, %v35_v14  }
  0x1e   :  { %136 = vperm.xlu1 %446, %v98_v15  }
  0x1f   :  { %131 = vperm.xlu0 %445, %v97_v16  }
  0x22   :  { %182 = vperm.xlu1 %446, %v168_v17  }
  0x23   :  { %177 = vperm.xlu0 %445, %v167_v18  }
  0x26   :  { %192 = vperm.xlu1 %446, %v170_v19  }
  0x27   :  { %187 = vperm.xlu0 %445, %v169_v20  }
  0x2a   :  { %202 = vperm.xlu1 %446, %v172_v22  }
  0x2b   :  { %197 = vperm.xlu0 %445, %v171_v23  }
  0x2e   :  { %212 = vperm.xlu1 %446, %v174_v24  }
  0x2f   :  { %207 = vperm.xlu0 %445, %v173_v25  }
  0x33   :  { %329 = vperm.xlu0 %445, %v326_v26  }
  0x81   :  { %v102_v28 = vpop.permute.xlu1 %101 }
  0x82   :  { %v40_v29 = vpop.permute.xlu0 %39 }
  0x83   :  { %v83_v30 = vmul.f32 %v390_v27, %v40_v29 }
  0x85   :  { %v107_v31 = vpop.permute.xlu1 %106  ;;  %v139_v33 = vadd.f32 %v102_v28, %v83_v30 }
  0x86   :  { %v45_v32 = vpop.permute.xlu0 %44 }
  0x87   :  { %v84_v34 = vmul.f32 %v390_v27, %v45_v32  ;;  %v147_v38 = vmax.f32 %v139_v33, 0.0 }
  0x89   :  { %v140_v35 = vadd.f32 %v107_v31, %v84_v34  ;;  %v55_v36 = vpop.permute.xlu1 %54 }
  0x8a   :  { %v50_v37 = vpop.permute.xlu0 %49  ;;  %v86_v40 = vmul.f32 %v390_v27, %v55_v36 }
  0x8b   :  { %v148_v39 = vmax.f32 %v140_v35, 0.0  ;;  %v85_v41 = vmul.f32 %v390_v27, %v50_v37 }
  0x8d   :  { %v163_v42 = vpack.c.bf16 %v148_v39, %v147_v38  ;;  %v117_v43 = vpop.permute.xlu1 %116 }
  0x8e   :  { %v112_v44 = vpop.permute.xlu0 %111  ;;  %v142_v45 = vadd.f32 %v117_v43, %v86_v40 }
  0x8f   :  { %v141_v46 = vadd.f32 %v112_v44, %v85_v41  ;;  %413 = vmatprep.subr.bf16.mxu0 %v163_v42 }
  0x90   :  { %414 = vmatpush3.bf16.msra.mxu0 %v163_v42  ;;  %v150_v47 = vmax.f32 %v142_v45, 0.0 }
  0x91   :  { %v149_v48 = vmax.f32 %v141_v46, 0.0  ;;  %v65_v49 = vpop.permute.xlu1 %64 }
  0x92   :  { %v60_v50 = vpop.permute.xlu0 %59  ;;  %v88_v52 = vmul.f32 %v390_v27, %v65_v49 }
  0x93   :  { %v164_v51 = vpack.c.bf16 %v150_v47, %v149_v48  ;;  %v87_v53 = vmul.f32 %v390_v27, %v60_v50  ;;  %v321_v48 = vld [vmem:[%s634_s5] sm:$0x3] }
  0x95   :  { %415 = vmatprep.subr.bf16.mxu0 %v164_v51  ;;  %v127_v54 = vpop.permute.xlu1 %126 }
  0x96   :  { %v122_v55 = vpop.permute.xlu0 %121  ;;  %416 = vmatpush3.bf16.msra.mxu0 %v164_v51  ;;  %v144_v56 = vadd.f32 %v127_v54, %v88_v52 }
  0x97   :  { %v143_v57 = vadd.f32 %v122_v55, %v87_v53 }
  0x98   :  { %v152_v58 = vmax.f32 %v144_v56, 0.0 }
  0x99   :  { %v151_v59 = vmax.f32 %v143_v57, 0.0  ;;  %v75_v60 = vpop.permute.xlu1 %74 }
  0x9a   :  { %v70_v61 = vpop.permute.xlu0 %69  ;;  %v90_v63 = vmul.f32 %v390_v27, %v75_v60 }
  0x9b   :  { %v165_v62 = vpack.c.bf16 %v152_v58, %v151_v59  ;;  %v89_v0 = vmul.f32 %v390_v27, %v70_v61 }
  0x9d   :  { %417 = vmatprep.subr.bf16.mxu0 %v165_v62  ;;  %v137_v1 = vpop.permute.xlu1 %136 }
  0x9e   :  { %v132_v2 = vpop.permute.xlu0 %131  ;;  %418 = vmatpush3.bf16.msra.mxu0 %v165_v62  ;;  %v146_v3 = vadd.f32 %v137_v1, %v90_v63 }
  0x9f   :  { %v145_v4 = vadd.f32 %v132_v2, %v89_v0 }
  0xa0   :  { %v154_v5 = vmax.f32 %v146_v3, 0.0 }
  0xa1   :  { %v153_v6 = vmax.f32 %v145_v4, 0.0  ;;  %v183_v13 = vpop.permute.xlu1 %182 }
  0xa2   :  { %v178_v12 = vpop.permute.xlu0 %177 }
  0xa3   :  { %v166_v7 = vpack.c.bf16 %v154_v5, %v153_v6 }
  0xa5   :  { %419 = vmatprep.subr.bf16.mxu0 %v166_v7  ;;  %v193_v15 = vpop.permute.xlu1 %192 }
  0xa6   :  { %420 = vmatpush3.bf16.msra.mxu0 %v166_v7  ;;  %v188_v14 = vpop.permute.xlu0 %187 }
  0xa9   :  { %422 = vmatmul.mubr.msk.bf16.vlgmr.msra.gmra.mrb[0].mxu0 %vm235_vm0, %v448_v8  ;;  %v203_v24 = vpop.permute.xlu1 %202 }
  0xaa   :  { %425 = vmatprep.mubr.msk.bf16.mxu0 %vm235_vm0, %v449_v9  ;;  %v198_v19 = vpop.permute.xlu0 %197 }
  0xad   :  { %v213_v36 = vpop.permute.xlu1 %212 }
  0xae   :  { %v208_v31 = vpop.permute.xlu0 %207 }
  0xb1   :  { %426 = vmatmul.mubr.msk.bf16.gmra.mrb[4].mxu0 %vm235_vm0, %v450_v10 }
  0xb2   :  { %v330_v49 = vpop.permute.xlu0 %329 }
 0x17c   :  { %v423_v16 = vpop.f32.mrb[0].mxu0 }
 0x17d   :  { %v291_v17 = vadd.f32 %v423_v16, %v188_v14  ;;  %v282_v18 = vpop.f32.mrb[1].mxu0 }
 0x17e   :  { %v283_v20 = vadd.f32 %v282_v18, %v178_v12  ;;  %v424_v21 = vpop.f32.mrb[2].mxu0 }
 0x17f   :  { %v294_v22 = vadd.f32 %v424_v21, %v193_v15  ;;  %v285_v23 = vpop.f32.mrb[3].mxu0  ;;  %v315_v26 = vmax.f32 %v291_v17, 0.0 }
 0x180   :  { %v286_v25 = vadd.f32 %v285_v23, %v183_v13  ;;  %v313_v28 = vmax.f32 %v283_v20, 0.0 }
 0x181   :  { %v316_v27 = vmax.f32 %v294_v22, 0.0 }
 0x182   :  { %v314_v29 = vmax.f32 %v286_v25, 0.0 }
 0x183   :  { %v323_v30 = vpack.c.bf16 %v316_v27, %v315_v26 }
 0x184   :  { %v427_v32 = vpop.f32.mrb[4].mxu0  ;;  %v322_v33 = vpack.c.bf16 %v314_v29, %v313_v28 }
 0x185   :  { %v307_v34 = vadd.f32 %v427_v32, %v208_v31  ;;  %v298_v35 = vpop.f32.mrb[5].mxu0 }
 0x186   :  { %v299_v37 = vadd.f32 %v298_v35, %v198_v19  ;;  %v428_v38 = vpop.f32.mrb[6].mxu0  ;;  %430 = vmatpush3.bf16.msra.mxu1 %v322_v33 }
 0x187   :  { %v310_v39 = vadd.f32 %v428_v38, %v213_v36  ;;  %v301_v40 = vpop.f32.mrb[7].mxu0  ;;  %431 = vmatprep.subr.bf16.mxu1 %v476_v11  ;;  %v319_v42 = vmax.f32 %v307_v34, 0.0 }
 0x188   :  { %v302_v41 = vadd.f32 %v301_v40, %v203_v24  ;;  %v317_v44 = vmax.f32 %v299_v37, 0.0 }
 0x189   :  { %v320_v43 = vmax.f32 %v310_v39, 0.0 }
 0x18a   :  { %v318_v45 = vmax.f32 %v302_v41, 0.0  ;;  %432 = vmatpush3.bf16.msra.mxu1 %v323_v30 }
 0x18b   :  { %v325_v46 = vpack.c.bf16 %v320_v43, %v319_v42  ;;  %433 = vmatprep.subr.bf16.mxu1 %v476_v11 }
 0x18c   :  { %v324_v47 = vpack.c.bf16 %v318_v45, %v317_v44 }
 0x18e   :  { %434 = vmatpush3.bf16.msra.mxu1 %v324_v47 }
 0x18f   :  { %435 = vmatprep.subr.bf16.mxu1 %v476_v11 }
 0x192   :  { %436 = vmatpush3.bf16.msra.mxu1 %v325_v46 }
 0x195   :  { %438 = vmatmul.mubr.msk.bf16.vlgmr.msra.gmra.mrb[0].mxu1 %vm235_vm0, %v321_v48 }
 0x268   :  { %v369_v50 = vpop.f32.mrb[0].mxu1 }
 0x269   :  { %v370_v51 = vadd.f32 %v369_v50, %v330_v49  ;;  %v439_v52 = vpop.f32.mrb[1].mxu1 }
 0x26a   :  { %v372_v53 = vpop.f32.mrb[2].mxu1 }
 0x26b   :  { %375 = vst [vmem:[#allocation2] sm:$0xf] %v370_v51  ;;  %v440_v54 = vpop.f32.mrb[3].mxu1 }
 0x26c   :  { %462 = shalt.err (!%p459_p4)
}
 0x26d   :  { %s463_s14 = scalar_lea.hbm %s636_s7, 64 }
 0x26e   :  { %p464_p5 = scmp.ne.s32.totalorder %s636_s7, %s463_s14  ;;  %p467_p6 = scmp.lt.u32.totalorder %s463_s14, %s636_s7 }
 0x270   :  { %p469_p7 = pnand %p467_p6, %p464_p5 }
 0x272   :  { %472 = shalt.err (!%p469_p7)
}
 0x273   :  { %385 = dma.vmem_to_hbm [thread:$0]  %s383_s12, 64, %s636_s7, [#allocation3]  }
 0x274   :  { %473 = dma.done.wait [#allocation3], 64  }
 0x275   :  { %474 = vsyncadd [#allocation3], 4294967232 }
 0x276   :  { %389 = vsyncpa [#allocation3], 1 }

</bundles_post_ra>
